<compile_context>
chip_gen: v6e
topology: v6e:2x2x1
jax: 0.10.0
libtpu: 0.0.40
codegen_flags: <defaults>
</compile_context>

<pallas_src>
import jax
import jax.numpy as jnp
import numpy as np
from jax.experimental import pallas as pl
from jax.experimental.pallas import tpu as pltpu

BN_EPS = 1e-5
LANE = 128                             # output channels padded to a multiple of this
DEFAULT_VMEM_BUDGET = 32 * 1024 * 1024
VMEM_CAP = 48 * 1024 * 1024            # stay well under v7x's 64 MiB physical VMEM


def _round_up(x, m):
    return ((x + m - 1) // m) * m


# ------------------------------- fused kernel ------------------------------- #
def _make_block_kernel(stride, ho, wo, cin, cout, cp, projection, hh):
    """Builds the fused ResidualBlock kernel (closure over static shapes).

    Ref layout (batch dim squeezed out by the BlockSpec):
      xin_ref : (rows, width, cin)      padded input (stride 1), or the 2x2 parity planes
                                        stacked along the row axis (stride 2, `hh` rows each)
      w1_ref  : (9*cin,  cp) bf16       conv1 weights, BN1 folded
      b1_ref  : (1, cp)      f32
      w2_ref  : (9*cout, cp) bf16       conv2 weights, BN2 folded
      b2_ref  : (1, cp)      f32
      ws_ref  : (cin, cp)    bf16       1x1 projection weights, BNs folded (projection only)
      bs_ref  : (1, cp)      f32
      o_ref   : (ho, wo, cp) bf16
      y1_ref  : (ho+2, wo+2, cout) bf16 VMEM scratch (conv1 output with zero halo)
    """

    def _conv1_tap(xin_ref, r, dy, dx):
        # (wo, cin) input view feeding conv1 output row r, tap (dy, dx).
        if stride == 1:
            row = xin_ref[r + dy]                              # (wp, cin)
            return row[dx:dx + wo, :]
        plane = 2 * (dy % 2) + (dx % 2)                        # parity plane (dy%2, dx%2)
        row = xin_ref[plane * hh + r + dy // 2]                # (wh, cin)
        return row[dx // 2:dx // 2 + wo, :]

    def _shortcut_row(xin_ref, r):
        # (wo, cin) input row feeding the shortcut (1x1 conv or identity) at output row r.
        if stride == 1:
            return xin_ref[r + 1][1:1 + wo, :]
        return xin_ref[3 * hh + r][0:wo, :]                    # parity plane (1, 1)

    def kernel(*refs):
        if projection:
            xin_ref, w1_ref, b1_ref, w2_ref, b2_ref, ws_ref, bs_ref, o_ref, y1_ref = refs
        else:
            xin_ref, w1_ref, b1_ref, w2_ref, b2_ref, o_ref, y1_ref = refs

        # zero halo rows of the conv1->conv2 intermediate (left/right halo cols are written
        # together with each row below, so no full-buffer memset is needed).
        zrow = jnp.zeros((wo + 2, cout), jnp.bfloat16)
        y1_ref[0] = zrow
        y1_ref[ho + 1] = zrow

        # --- conv1 (3x3, stride s) + BN1 + ReLU -> VMEM scratch (never touches HBM) ---
        @pl.loop(0, ho)
        def _conv1(r):
            taps = [_conv1_tap(xin_ref, r, dy, dx)
                    for dy in range(3) for dx in range(3)]
            p = jnp.concatenate(taps, axis=-1).astype(jnp.bfloat16)      # (wo, 9*cin)
            acc = jnp.dot(p, w1_ref[...], preferred_element_type=jnp.float32)
            y = jnp.maximum(acc + b1_ref[...], 0.0)[:, :cout].astype(jnp.bfloat16)
            zc = jnp.zeros((1, cout), jnp.bfloat16)
            y1_ref[r + 1] = jnp.concatenate([zc, y, zc], axis=0)          # (wo+2, cout)

        # --- conv2 (3x3, s=1) + BN2, shortcut, residual add, final ReLU ---
        @pl.loop(0, ho)
        def _conv2(r):
            taps = [y1_ref[r + dy][dx:dx + wo, :]
                    for dy in range(3) for dx in range(3)]
            p = jnp.concatenate(taps, axis=-1)                            # (wo, 9*cout) bf16
            left = jnp.dot(p, w2_ref[...],
                           preferred_element_type=jnp.float32) + b2_ref[...]
            if projection:
                sc = _shortcut_row(xin_ref, r).astype(jnp.bfloat16)       # (wo, cin)
                right = jnp.dot(sc, ws_ref[...],
                                preferred_element_type=jnp.float32) + bs_ref[...]
            else:
                # identity shortcut: exact f32 residual, no matmul, no bf16 rounding
                res = _shortcut_row(xin_ref, r).astype(jnp.float32)       # (wo, cout)
                if cp > cout:
                    res = jnp.concatenate(
                        [res, jnp.zeros((wo, cp - cout), jnp.float32)], axis=-1)
                right = res
            o_ref[r] = jnp.maximum(left + right, 0.0).astype(o_ref.dtype)

    return kernel


# ------------------------------ pallas_call wrapper ------------------------- #
def _fused_block_pallas(xin, w1, b1, w2, b2, ws, bs, *, stride, ho, wo, cin, cout, cp,
                        projection):
    n, rows, width, _ = xin.shape
    hh = rows // 4 if stride == 2 else 0
    kernel = _make_block_kernel(stride, ho, wo, cin, cout, cp, projection, hh)

    x_spec = pl.BlockSpec((None,) + tuple(xin.shape[1:]), lambda i: (i, 0, 0, 0))

    def const2d(arr):
        # whole-array, grid-constant block: DMA'd once, stays VMEM-resident.
        return pl.BlockSpec(tuple(arr.shape), lambda i: (0, 0))

    in_specs = [x_spec, const2d(w1), const2d(b1), const2d(w2), const2d(b2)]
    args = [xin, w1, b1, w2, b2]
    if projection:
        in_specs += [const2d(ws), const2d(bs)]
        args += [ws, bs]
    out_spec = pl.BlockSpec((None, ho, wo, cp), lambda i: (i, 0, 0, 0))

    # Per-step VMEM footprint: image/output blocks double-buffered, constant weight blocks,
    # plus the y1 scratch.  Only raise the limit when actually needed; cap for v7x (64 MiB
    # physical per TensorCore).
    per_image_in = (xin.size // n) * xin.dtype.itemsize
    per_image_out = ho * wo * cp * 2
    weight_bytes = sum(a.size * a.dtype.itemsize for a in args[1:])
    scratch_bytes = (ho + 2) * (wo + 2) * cout * 2
    step_bytes = 2 * per_image_in + 2 * per_image_out + 2 * weight_bytes + scratch_bytes
    vmem_kw = {}
    if step_bytes > DEFAULT_VMEM_BUDGET // 2:
        vmem_kw["vmem_limit_bytes"] = min(2 * step_bytes, VMEM_CAP)

    flops = 2 * n * ho * wo * cp * (9 * cin + 9 * cout + (cin if projection else 0))
    bytes_accessed = (sum(a.size * a.dtype.itemsize for a in args)
                      + n * ho * wo * cp * 2)
    cost = pl.CostEstimate(flops=flops, transcendentals=0, bytes_accessed=bytes_accessed)

    return pl.pallas_call(
        kernel,
        out_shape=jax.ShapeDtypeStruct((n, ho, wo, cp), jnp.bfloat16),
        grid_spec=pltpu.PrefetchScalarGridSpec(
            num_scalar_prefetch=0,
            grid=(n,),                                 # flat parallel axis (megacore / 2-TC)
            in_specs=in_specs,
            out_specs=out_spec,
            scratch_shapes=[pltpu.VMEM((ho + 2, wo + 2, cout), jnp.bfloat16)],
        ),
        compiler_params=pltpu.CompilerParams(
            dimension_semantics=("parallel",), **vmem_kw),
        cost_estimate=cost,
    )(*args)


# --------------------------------- JAX glue --------------------------------- #
def _fold_bn_conv(w_oihw, gamma, beta, mean, var, cout_pad, eps=BN_EPS):
    """Fold inference BN into the conv; bf16 (KH*KW*Cin, cout_pad) weight + f32 shift.

    K order is (ky, kx, cin) to match the kernel's tap-concatenation order."""
    scale = gamma / jnp.sqrt(var + eps)
    shift = beta - mean * scale
    w_hat = w_oihw * scale[:, None, None, None]                 # (O, I, KH, KW)
    cout, cin, kh, kw = w_hat.shape
    w_flat = jnp.transpose(w_hat, (2, 3, 1, 0)).reshape(kh * kw * cin, cout)
    w_flat = jnp.pad(w_flat, ((0, 0), (0, cout_pad - cout)))
    b_flat = jnp.pad(shift, (0, cout_pad - cout)).reshape(1, cout_pad)
    return w_flat.astype(jnp.bfloat16), b_flat.astype(jnp.float32)


def _parity_planes(xp):
    """(N, Hp, Wp, C) padded input -> (N, 4*ceil(Hp/2), ceil(Wp/2), C).

    Plane (py, px) = xp[:, py::2, px::2, :] starts at row (2*py + px) * ceil(Hp/2); this
    turns every stride-2 tap into a static slice inside the kernel."""
    n, hp, wp, c = xp.shape
    hp2, wp2 = _round_up(hp, 2), _round_up(wp, 2)
    xpe = jnp.pad(xp, ((0, 0), (0, hp2 - hp), (0, wp2 - wp), (0, 0)))
    xpar = xpe.reshape(n, hp2 // 2, 2, wp2 // 2, 2, c).transpose(0, 2, 4, 1, 3, 5)
    return xpar.reshape(n, 4 * (hp2 // 2), wp2 // 2, c)


def residual_block_forward(x_nchw, params, inchannel, outchannel, stride):
    assert stride in (1, 2)
    x = jnp.transpose(x_nchw, (0, 2, 3, 1)).astype(jnp.float32)     # NHWC
    n, h, w, _ = x.shape
    ho = (h + 2 - 3) // stride + 1
    wo = (w + 2 - 3) // stride + 1
    cp = _round_up(outchannel, LANE)
    projection = (stride != 1) or (inchannel != outchannel)

    w1, b1 = _fold_bn_conv(params["w1"], params["bn1_g"], params["bn1_b"],
                           params["bn1_m"], params["bn1_v"], cp)
    w2, b2 = _fold_bn_conv(params["w2"], params["bn2_g"], params["bn2_b"],
                           params["bn2_m"], params["bn2_v"], cp)

    xp = jnp.pad(x, ((0, 0), (1, 1), (1, 1), (0, 0)))               # conv padding = 1

    if projection:
        ws, bs = _fold_bn_conv(params["ws"], params["bns_g"], params["bns_b"],
                               params["bns_m"], params["bns_v"], cp)
        # projection branch is fully matmul-based -> bf16 input halves HBM traffic
        xin = _parity_planes(xp.astype(jnp.bfloat16)) if stride == 2 \
            else xp.astype(jnp.bfloat16)
    else:
        ws = bs = None
        xin = xp                                                    # f32: exact residual add

    out = _fused_block_pallas(xin, w1, b1, w2, b2, ws, bs,
                              stride=stride, ho=ho, wo=wo, cin=inchannel,
                              cout=outchannel, cp=cp, projection=projection)
    out = out[..., :outchannel].astype(jnp.float32)                 # drop channel padding
    return jnp.transpose(out, (0, 3, 1, 2))                         # back to NCHW


residual_block = jax.jit(residual_block_forward, static_argnums=(2, 3, 4))


# ----------------------------- pure-JAX reference --------------------------- #
def _ref_forward(x, params, inchannel, outchannel, stride):
    def conv(inp, w, s, p):
        return jax.lax.conv_general_dilated(
            inp, w, (s, s), [(p, p), (p, p)],
            dimension_numbers=("NCHW", "OIHW", "NCHW"))

    def bn(inp, g, b, m, v):
        g, b, m, v = (t[None, :, None, None] for t in (g, b, m, v))
        return (inp - m) / jnp.sqrt(v + BN_EPS) * g + b

    y = jax.nn.relu(bn(conv(x, params["w1"], stride, 1),
                       params["bn1_g"], params["bn1_b"], params["bn1_m"], params["bn1_v"]))
    y = bn(conv(y, params["w2"], 1, 1),
           params["bn2_g"], params["bn2_b"], params["bn2_m"], params["bn2_v"])
    if stride != 1 or inchannel != outchannel:
        sc = bn(conv(x, params["ws"], stride, 0),
                params["bns_g"], params["bns_b"], params["bns_m"], params["bns_v"])
    else:
        sc = x
    return jax.nn.relu(y + sc)


# ------------------------------------ main ---------------------------------- #
def _make_params(key, inchannel, outchannel):
    ks = jax.random.split(key, 16)

    def bn_params(k0, k1, k2, k3, c):
        return (jax.random.uniform(k0, (c,), jnp.float32, 0.5, 1.5),   # gamma
                jax.random.normal(k1, (c,), jnp.float32) * 0.1,        # beta
                jax.random.normal(k2, (c,), jnp.float32) * 0.1,        # running mean
                jax.random.uniform(k3, (c,), jnp.float32, 0.5, 1.5))   # running var

    p = {}
    p["w1"] = jax.random.normal(ks[0], (outchannel, inchannel, 3, 3), jnp.float32) * 0.1
    p["bn1_g"], p["bn1_b"], p["bn1_m"], p["bn1_v"] = bn_params(ks[1], ks[2], ks[3], ks[4], outchannel)
    p["w2"] = jax.random.normal(ks[5], (outchannel, outchannel, 3, 3), jnp.float32) * 0.1
    p["bn2_g"], p["bn2_b"], p["bn2_m"], p["bn2_v"] = bn_params(ks[6], ks[7], ks[8], ks[9], outchannel)
    p["ws"] = jax.random.normal(ks[10], (outchannel, inchannel, 1, 1), jnp.float32) * 0.1
    p["bns_g"], p["bns_b"], p["bns_m"], p["bns_v"] = bn_params(ks[11], ks[12], ks[13], ks[14], outchannel)
    return p


if __name__ == "__main__":
    key = jax.random.PRNGKey(0)
    k1, k2, k3, k4 = jax.random.split(key, 4)

    # case 1: projection shortcut (stride=2, inchannel != outchannel)
    N, CIN, COUT, H, W, STRIDE = 2, 4, 8, 16, 16, 2
    x = jax.random.normal(k1, (N, CIN, H, W), jnp.float32)
    params = _make_params(k2, CIN, COUT)
    out = jax.block_until_ready(residual_block(x, params, CIN, COUT, STRIDE))
    ref = jax.block_until_ready(_ref_forward(x, params, CIN, COUT, STRIDE))
    np.testing.assert_allclose(np.asarray(out), np.asarray(ref), rtol=3e-2, atol=3e-2)

    # case 2: identity shortcut (stride=1, inchannel == outchannel)
    x2 = jax.random.normal(k3, (N, COUT, H, W), jnp.float32)
    params2 = _make_params(k4, COUT, COUT)
    out2 = jax.block_until_ready(residual_block(x2, params2, COUT, COUT, 1))
    ref2 = jax.block_until_ready(_ref_forward(x2, params2, COUT, COUT, 1))
    np.testing.assert_allclose(np.asarray(out2), np.asarray(ref2), rtol=3e-2, atol=3e-2)

    print("KERNEL_OK")
</pallas_src>

<mosaic_0001>
module attributes {stable_mosaic.version = 11 : i64} {
  func.func @kernel(%arg0: i32, %arg1: memref<1x36x9x4xbf16, #tpu.memory_space<vmem>>, %arg2: memref<36x128xbf16, #tpu.memory_space<vmem>>, %arg3: memref<1x128xf32, #tpu.memory_space<vmem>>, %arg4: memref<72x128xbf16, #tpu.memory_space<vmem>>, %arg5: memref<1x128xf32, #tpu.memory_space<vmem>>, %arg6: memref<4x128xbf16, #tpu.memory_space<vmem>>, %arg7: memref<1x128xf32, #tpu.memory_space<vmem>>, %arg8: memref<1x8x8x128xbf16, #tpu.memory_space<vmem>>, %arg9: memref<10x10x8xbf16, #tpu.memory_space<vmem>>) attributes {dimension_semantics = [#tpu.dimension_semantics<parallel>], iteration_bounds = array<i64: 2>, scalar_prefetch = 0 : i64, scratch_operands = 1 : i64, tpu.core_type = #tpu.core_type<tc>, window_params = [{transform_indices = @transform_0, window_bounds = array<i64: 1, 36, 9, 4>}, {pipeline_mode = #tpu.pipeline_mode<synchronous>, transform_indices = @transform_1, window_bounds = array<i64: 36, 128>}, {pipeline_mode = #tpu.pipeline_mode<synchronous>, transform_indices = @transform_2, window_bounds = array<i64: 1, 128>}, {pipeline_mode = #tpu.pipeline_mode<synchronous>, transform_indices = @transform_3, window_bounds = array<i64: 72, 128>}, {pipeline_mode = #tpu.pipeline_mode<synchronous>, transform_indices = @transform_4, window_bounds = array<i64: 1, 128>}, {pipeline_mode = #tpu.pipeline_mode<synchronous>, transform_indices = @transform_5, window_bounds = array<i64: 4, 128>}, {pipeline_mode = #tpu.pipeline_mode<synchronous>, transform_indices = @transform_6, window_bounds = array<i64: 1, 128>}, {transform_indices = @transform_7, window_bounds = array<i64: 1, 8, 8, 128>}]} {
    %cst = arith.constant 0.000000e+00 : bf16
    %0 = vector.broadcast %cst : bf16 to vector<10x8xbf16>
    %c0 = arith.constant 0 : index
    %c0_0 = arith.constant 0 : index
    %c0_1 = arith.constant 0 : index
    %1 = vector.load %arg9[%c0, %c0_0, %c0_1] : memref<10x10x8xbf16, #tpu.memory_space<vmem>>, vector<1x10x8xbf16>
    %2 = vector.shape_cast %1 : vector<1x10x8xbf16> to vector<10x8xbf16>
    %3 = vector.shape_cast %0 : vector<10x8xbf16> to vector<1x10x8xbf16>
    tpu.vector_store %arg9[%c0, %c0_0, %c0_1], %3 {strides = array<i32>} : memref<10x10x8xbf16, #tpu.memory_space<vmem>>, vector<1x10x8xbf16>,
    %c9 = arith.constant 9 : index
    %c0_2 = arith.constant 0 : index
    %c0_3 = arith.constant 0 : index
    %4 = vector.load %arg9[%c9, %c0_2, %c0_3] : memref<10x10x8xbf16, #tpu.memory_space<vmem>>, vector<1x10x8xbf16>
    %5 = vector.shape_cast %4 : vector<1x10x8xbf16> to vector<10x8xbf16>
    %6 = vector.shape_cast %0 : vector<10x8xbf16> to vector<1x10x8xbf16>
    tpu.vector_store %arg9[%c9, %c0_2, %c0_3], %6 {strides = array<i32>} : memref<10x10x8xbf16, #tpu.memory_space<vmem>>, vector<1x10x8xbf16>,
    %c0_i32 = arith.constant 0 : i32
    %c8_i32 = arith.constant 8 : i32
    %7 = arith.addi %c0_i32, %c8_i32 : i32
    %c1_i32 = arith.constant 1 : i32
    scf.for %arg10 = %c0_i32 to %7 step %c1_i32  : i32 {
      %c1_i32_9 = arith.constant 1 : i32
      %9 = arith.muli %arg10, %c1_i32_9 : i32
      %c0_i32_10 = arith.constant 0 : i32
      %10 = arith.addi %c0_i32_10, %9 : i32
      %c0_i32_11 = arith.constant 0 : i32
      %11 = arith.addi %c0_i32_11, %10 : i32
      %c0_i32_12 = arith.constant 0 : i32
      %12 = arith.addi %11, %c0_i32_12 : i32
      %c0_13 = arith.constant 0 : index
      %13 = arith.index_cast %12 : i32 to index
      %c0_14 = arith.constant 0 : index
      %c0_15 = arith.constant 0 : index
      %14 = vector.load %arg1[%c0_13, %13, %c0_14, %c0_15] : memref<1x36x9x4xbf16, #tpu.memory_space<vmem>>, vector<1x1x9x4xbf16>
      %15 = vector.shape_cast %14 : vector<1x1x9x4xbf16> to vector<9x4xbf16>
      %16 = vector.extract_strided_slice %15 {offsets = [0, 0], sizes = [8, 4], strides = [1, 1]} : vector<9x4xbf16> to vector<8x4xbf16>
      %c9_i32 = arith.constant 9 : i32
      %17 = arith.addi %c9_i32, %10 : i32
      %c0_i32_16 = arith.constant 0 : i32
      %18 = arith.addi %17, %c0_i32_16 : i32
      %c0_17 = arith.constant 0 : index
      %19 = arith.index_cast %18 : i32 to index
      %c0_18 = arith.constant 0 : index
      %c0_19 = arith.constant 0 : index
      %20 = vector.load %arg1[%c0_17, %19, %c0_18, %c0_19] : memref<1x36x9x4xbf16, #tpu.memory_space<vmem>>, vector<1x1x9x4xbf16>
      %21 = vector.shape_cast %20 : vector<1x1x9x4xbf16> to vector<9x4xbf16>
      %22 = vector.extract_strided_slice %21 {offsets = [0, 0], sizes = [8, 4], strides = [1, 1]} : vector<9x4xbf16> to vector<8x4xbf16>
      %c0_i32_20 = arith.constant 0 : i32
      %23 = arith.addi %c0_i32_20, %10 : i32
      %c0_i32_21 = arith.constant 0 : i32
      %24 = arith.addi %23, %c0_i32_21 : i32
      %c0_22 = arith.constant 0 : index
      %25 = arith.index_cast %24 : i32 to index
      %c0_23 = arith.constant 0 : index
      %c0_24 = arith.constant 0 : index
      %26 = vector.load %arg1[%c0_22, %25, %c0_23, %c0_24] : memref<1x36x9x4xbf16, #tpu.memory_space<vmem>>, vector<1x1x9x4xbf16>
      %27 = vector.shape_cast %26 : vector<1x1x9x4xbf16> to vector<9x4xbf16>
      %28 = vector.extract_strided_slice %27 {offsets = [1, 0], sizes = [8, 4], strides = [1, 1]} : vector<9x4xbf16> to vector<8x4xbf16>
      %c18_i32 = arith.constant 18 : i32
      %29 = arith.addi %c18_i32, %10 : i32
      %c0_i32_25 = arith.constant 0 : i32
      %30 = arith.addi %29, %c0_i32_25 : i32
      %c0_26 = arith.constant 0 : index
      %31 = arith.index_cast %30 : i32 to index
      %c0_27 = arith.constant 0 : index
      %c0_28 = arith.constant 0 : index
      %32 = vector.load %arg1[%c0_26, %31, %c0_27, %c0_28] : memref<1x36x9x4xbf16, #tpu.memory_space<vmem>>, vector<1x1x9x4xbf16>
      %33 = vector.shape_cast %32 : vector<1x1x9x4xbf16> to vector<9x4xbf16>
      %34 = vector.extract_strided_slice %33 {offsets = [0, 0], sizes = [8, 4], strides = [1, 1]} : vector<9x4xbf16> to vector<8x4xbf16>
      %c27_i32 = arith.constant 27 : i32
      %35 = arith.addi %c27_i32, %10 : i32
      %c0_i32_29 = arith.constant 0 : i32
      %36 = arith.addi %35, %c0_i32_29 : i32
      %c0_30 = arith.constant 0 : index
      %37 = arith.index_cast %36 : i32 to index
      %c0_31 = arith.constant 0 : index
      %c0_32 = arith.constant 0 : index
      %38 = vector.load %arg1[%c0_30, %37, %c0_31, %c0_32] : memref<1x36x9x4xbf16, #tpu.memory_space<vmem>>, vector<1x1x9x4xbf16>
      %39 = vector.shape_cast %38 : vector<1x1x9x4xbf16> to vector<9x4xbf16>
      %40 = vector.extract_strided_slice %39 {offsets = [0, 0], sizes = [8, 4], strides = [1, 1]} : vector<9x4xbf16> to vector<8x4xbf16>
      %c18_i32_33 = arith.constant 18 : i32
      %41 = arith.addi %c18_i32_33, %10 : i32
      %c0_i32_34 = arith.constant 0 : i32
      %42 = arith.addi %41, %c0_i32_34 : i32
      %c0_35 = arith.constant 0 : index
      %43 = arith.index_cast %42 : i32 to index
      %c0_36 = arith.constant 0 : index
      %c0_37 = arith.constant 0 : index
      %44 = vector.load %arg1[%c0_35, %43, %c0_36, %c0_37] : memref<1x36x9x4xbf16, #tpu.memory_space<vmem>>, vector<1x1x9x4xbf16>
      %45 = vector.shape_cast %44 : vector<1x1x9x4xbf16> to vector<9x4xbf16>
      %46 = vector.extract_strided_slice %45 {offsets = [1, 0], sizes = [8, 4], strides = [1, 1]} : vector<9x4xbf16> to vector<8x4xbf16>
      %c0_i32_38 = arith.constant 0 : i32
      %47 = arith.addi %c0_i32_38, %10 : i32
      %c1_i32_39 = arith.constant 1 : i32
      %48 = arith.addi %47, %c1_i32_39 : i32
      %c0_40 = arith.constant 0 : index
      %49 = arith.index_cast %48 : i32 to index
      %c0_41 = arith.constant 0 : index
      %c0_42 = arith.constant 0 : index
      %50 = vector.load %arg1[%c0_40, %49, %c0_41, %c0_42] : memref<1x36x9x4xbf16, #tpu.memory_space<vmem>>, vector<1x1x9x4xbf16>
      %51 = vector.shape_cast %50 : vector<1x1x9x4xbf16> to vector<9x4xbf16>
      %52 = vector.extract_strided_slice %51 {offsets = [0, 0], sizes = [8, 4], strides = [1, 1]} : vector<9x4xbf16> to vector<8x4xbf16>
      %c9_i32_43 = arith.constant 9 : i32
      %53 = arith.addi %c9_i32_43, %10 : i32
      %c1_i32_44 = arith.constant 1 : i32
      %54 = arith.addi %53, %c1_i32_44 : i32
      %c0_45 = arith.constant 0 : index
      %55 = arith.index_cast %54 : i32 to index
      %c0_46 = arith.constant 0 : index
      %c0_47 = arith.constant 0 : index
      %56 = vector.load %arg1[%c0_45, %55, %c0_46, %c0_47] : memref<1x36x9x4xbf16, #tpu.memory_space<vmem>>, vector<1x1x9x4xbf16>
      %57 = vector.shape_cast %56 : vector<1x1x9x4xbf16> to vector<9x4xbf16>
      %58 = vector.extract_strided_slice %57 {offsets = [0, 0], sizes = [8, 4], strides = [1, 1]} : vector<9x4xbf16> to vector<8x4xbf16>
      %c0_i32_48 = arith.constant 0 : i32
      %59 = arith.addi %c0_i32_48, %10 : i32
      %c1_i32_49 = arith.constant 1 : i32
      %60 = arith.addi %59, %c1_i32_49 : i32
      %c0_50 = arith.constant 0 : index
      %61 = arith.index_cast %60 : i32 to index
      %c0_51 = arith.constant 0 : index
      %c0_52 = arith.constant 0 : index
      %62 = vector.load %arg1[%c0_50, %61, %c0_51, %c0_52] : memref<1x36x9x4xbf16, #tpu.memory_space<vmem>>, vector<1x1x9x4xbf16>
      %63 = vector.shape_cast %62 : vector<1x1x9x4xbf16> to vector<9x4xbf16>
      %64 = vector.extract_strided_slice %63 {offsets = [1, 0], sizes = [8, 4], strides = [1, 1]} : vector<9x4xbf16> to vector<8x4xbf16>
      %65 = tpu.concatenate %16, %22, %28, %34, %40, %46, %52, %58, %64 in 1 : vector<8x4xbf16>, vector<8x4xbf16>, vector<8x4xbf16>, vector<8x4xbf16>, vector<8x4xbf16>, vector<8x4xbf16>, vector<8x4xbf16>, vector<8x4xbf16>, vector<8x4xbf16> -> vector<8x36xbf16>
      %c0_53 = arith.constant 0 : index
      %c0_54 = arith.constant 0 : index
      %66 = vector.load %arg2[%c0_53, %c0_54] : memref<36x128xbf16, #tpu.memory_space<vmem>>, vector<36x128xbf16>
      %cst_55 = arith.constant dense<0.000000e+00> : vector<8x128xf32>
      %67 = tpu.matmul %65, %66, %cst_55 {dimension_numbers = #tpu.dot_dimension_numbers<[1], [0], [0], [1], [0, 0, 1, 1], [], []>} : vector<8x36xbf16>, vector<36x128xbf16>, vector<8x128xf32> -> vector<8x128xf32>
      %c0_56 = arith.constant 0 : index
      %c0_57 = arith.constant 0 : index
      %68 = vector.load %arg3[%c0_56, %c0_57] : memref<1x128xf32, #tpu.memory_space<vmem>>, vector<1x128xf32>
      %69 = vector.broadcast %68 : vector<1x128xf32> to vector<8x128xf32>
      %70 = arith.addf %67, %69 : vector<8x128xf32>
      %cst_58 = arith.constant 0.000000e+00 : f32
      %71 = vector.broadcast %cst_58 : f32 to vector<8x128xf32>
      %72 = arith.maximumf %70, %71 : vector<8x128xf32>
      %73 = vector.extract_strided_slice %72 {offsets = [0, 0], sizes = [8, 8], strides = [1, 1]} : vector<8x128xf32> to vector<8x8xf32>
      %74 = arith.truncf %73 : vector<8x8xf32> to vector<8x8xbf16>
      %cst_59 = arith.constant 0.000000e+00 : bf16
      %75 = vector.broadcast %cst_59 : bf16 to vector<1x8xbf16>
      %76 = tpu.concatenate %75, %74, %75 in 0 : vector<1x8xbf16>, vector<8x8xbf16>, vector<1x8xbf16> -> vector<10x8xbf16>
      %c1_i32_60 = arith.constant 1 : i32
      %77 = arith.addi %10, %c1_i32_60 : i32
      %78 = arith.index_cast %77 : i32 to index
      %c0_61 = arith.constant 0 : index
      %c0_62 = arith.constant 0 : index
      %79 = vector.load %arg9[%78, %c0_61, %c0_62] : memref<10x10x8xbf16, #tpu.memory_space<vmem>>, vector<1x10x8xbf16>
      %80 = vector.shape_cast %79 : vector<1x10x8xbf16> to vector<10x8xbf16>
      %81 = vector.shape_cast %76 : vector<10x8xbf16> to vector<1x10x8xbf16>
      tpu.vector_store %arg9[%78, %c0_61, %c0_62], %81 {strides = array<i32>} : memref<10x10x8xbf16, #tpu.memory_space<vmem>>, vector<1x10x8xbf16>,
    }
    %c8_i32_4 = arith.constant 8 : i32
    %c0_i32_5 = arith.constant 0 : i32
    %c8_i32_6 = arith.constant 8 : i32
    %8 = arith.addi %c0_i32_5, %c8_i32_6 : i32
    %c1_i32_7 = arith.constant 1 : i32
    scf.for %arg10 = %c0_i32_5 to %8 step %c1_i32_7  : i32 {
      %c1_i32_9 = arith.constant 1 : i32
      %9 = arith.muli %arg10, %c1_i32_9 : i32
      %c0_i32_10 = arith.constant 0 : i32
      %10 = arith.addi %c0_i32_10, %9 : i32
      %c0_i32_11 = arith.constant 0 : i32
      %11 = arith.addi %10, %c0_i32_11 : i32
      %12 = arith.index_cast %11 : i32 to index
      %c0_12 = arith.constant 0 : index
      %c0_13 = arith.constant 0 : index
      %13 = vector.load %arg9[%12, %c0_12, %c0_13] : memref<10x10x8xbf16, #tpu.memory_space<vmem>>, vector<1x10x8xbf16>
      %14 = vector.shape_cast %13 : vector<1x10x8xbf16> to vector<10x8xbf16>
      %15 = vector.extract_strided_slice %14 {offsets = [0, 0], sizes = [8, 8], strides = [1, 1]} : vector<10x8xbf16> to vector<8x8xbf16>
      %c0_i32_14 = arith.constant 0 : i32
      %16 = arith.addi %10, %c0_i32_14 : i32
      %17 = arith.index_cast %16 : i32 to index
      %c0_15 = arith.constant 0 : index
      %c0_16 = arith.constant 0 : index
      %18 = vector.load %arg9[%17, %c0_15, %c0_16] : memref<10x10x8xbf16, #tpu.memory_space<vmem>>, vector<1x10x8xbf16>
      %19 = vector.shape_cast %18 : vector<1x10x8xbf16> to vector<10x8xbf16>
      %20 = vector.extract_strided_slice %19 {offsets = [1, 0], sizes = [8, 8], strides = [1, 1]} : vector<10x8xbf16> to vector<8x8xbf16>
      %c0_i32_17 = arith.constant 0 : i32
      %21 = arith.addi %10, %c0_i32_17 : i32
      %22 = arith.index_cast %21 : i32 to index
      %c0_18 = arith.constant 0 : index
      %c0_19 = arith.constant 0 : index
      %23 = vector.load %arg9[%22, %c0_18, %c0_19] : memref<10x10x8xbf16, #tpu.memory_space<vmem>>, vector<1x10x8xbf16>
      %24 = vector.shape_cast %23 : vector<1x10x8xbf16> to vector<10x8xbf16>
      %25 = vector.extract_strided_slice %24 {offsets = [2, 0], sizes = [8, 8], strides = [1, 1]} : vector<10x8xbf16> to vector<8x8xbf16>
      %c1_i32_20 = arith.constant 1 : i32
      %26 = arith.addi %10, %c1_i32_20 : i32
      %27 = arith.index_cast %26 : i32 to index
      %c0_21 = arith.constant 0 : index
      %c0_22 = arith.constant 0 : index
      %28 = vector.load %arg9[%27, %c0_21, %c0_22] : memref<10x10x8xbf16, #tpu.memory_space<vmem>>, vector<1x10x8xbf16>
      %29 = vector.shape_cast %28 : vector<1x10x8xbf16> to vector<10x8xbf16>
      %30 = vector.extract_strided_slice %29 {offsets = [0, 0], sizes = [8, 8], strides = [1, 1]} : vector<10x8xbf16> to vector<8x8xbf16>
      %c1_i32_23 = arith.constant 1 : i32
      %31 = arith.addi %10, %c1_i32_23 : i32
      %32 = arith.index_cast %31 : i32 to index
      %c0_24 = arith.constant 0 : index
      %c0_25 = arith.constant 0 : index
      %33 = vector.load %arg9[%32, %c0_24, %c0_25] : memref<10x10x8xbf16, #tpu.memory_space<vmem>>, vector<1x10x8xbf16>
      %34 = vector.shape_cast %33 : vector<1x10x8xbf16> to vector<10x8xbf16>
      %35 = vector.extract_strided_slice %34 {offsets = [1, 0], sizes = [8, 8], strides = [1, 1]} : vector<10x8xbf16> to vector<8x8xbf16>
      %c1_i32_26 = arith.constant 1 : i32
      %36 = arith.addi %10, %c1_i32_26 : i32
      %37 = arith.index_cast %36 : i32 to index
      %c0_27 = arith.constant 0 : index
      %c0_28 = arith.constant 0 : index
      %38 = vector.load %arg9[%37, %c0_27, %c0_28] : memref<10x10x8xbf16, #tpu.memory_space<vmem>>, vector<1x10x8xbf16>
      %39 = vector.shape_cast %38 : vector<1x10x8xbf16> to vector<10x8xbf16>
      %40 = vector.extract_strided_slice %39 {offsets = [2, 0], sizes = [8, 8], strides = [1, 1]} : vector<10x8xbf16> to vector<8x8xbf16>
      %c2_i32 = arith.constant 2 : i32
      %41 = arith.addi %10, %c2_i32 : i32
      %42 = arith.index_cast %41 : i32 to index
      %c0_29 = arith.constant 0 : index
      %c0_30 = arith.constant 0 : index
      %43 = vector.load %arg9[%42, %c0_29, %c0_30] : memref<10x10x8xbf16, #tpu.memory_space<vmem>>, vector<1x10x8xbf16>
      %44 = vector.shape_cast %43 : vector<1x10x8xbf16> to vector<10x8xbf16>
      %45 = vector.extract_strided_slice %44 {offsets = [0, 0], sizes = [8, 8], strides = [1, 1]} : vector<10x8xbf16> to vector<8x8xbf16>
      %c2_i32_31 = arith.constant 2 : i32
      %46 = arith.addi %10, %c2_i32_31 : i32
      %47 = arith.index_cast %46 : i32 to index
      %c0_32 = arith.constant 0 : index
      %c0_33 = arith.constant 0 : index
      %48 = vector.load %arg9[%47, %c0_32, %c0_33] : memref<10x10x8xbf16, #tpu.memory_space<vmem>>, vector<1x10x8xbf16>
      %49 = vector.shape_cast %48 : vector<1x10x8xbf16> to vector<10x8xbf16>
      %50 = vector.extract_strided_slice %49 {offsets = [1, 0], sizes = [8, 8], strides = [1, 1]} : vector<10x8xbf16> to vector<8x8xbf16>
      %c2_i32_34 = arith.constant 2 : i32
      %51 = arith.addi %10, %c2_i32_34 : i32
      %52 = arith.index_cast %51 : i32 to index
      %c0_35 = arith.constant 0 : index
      %c0_36 = arith.constant 0 : index
      %53 = vector.load %arg9[%52, %c0_35, %c0_36] : memref<10x10x8xbf16, #tpu.memory_space<vmem>>, vector<1x10x8xbf16>
      %54 = vector.shape_cast %53 : vector<1x10x8xbf16> to vector<10x8xbf16>
      %55 = vector.extract_strided_slice %54 {offsets = [2, 0], sizes = [8, 8], strides = [1, 1]} : vector<10x8xbf16> to vector<8x8xbf16>
      %56 = tpu.concatenate %15, %20, %25, %30, %35, %40, %45, %50, %55 in 1 : vector<8x8xbf16>, vector<8x8xbf16>, vector<8x8xbf16>, vector<8x8xbf16>, vector<8x8xbf16>, vector<8x8xbf16>, vector<8x8xbf16>, vector<8x8xbf16>, vector<8x8xbf16> -> vector<8x72xbf16>
      %c0_37 = arith.constant 0 : index
      %c0_38 = arith.constant 0 : index
      %57 = vector.load %arg4[%c0_37, %c0_38] : memref<72x128xbf16, #tpu.memory_space<vmem>>, vector<72x128xbf16>
      %cst_39 = arith.constant dense<0.000000e+00> : vector<8x128xf32>
      %58 = tpu.matmul %56, %57, %cst_39 {dimension_numbers = #tpu.dot_dimension_numbers<[1], [0], [0], [1], [0, 0, 1, 1], [], []>} : vector<8x72xbf16>, vector<72x128xbf16>, vector<8x128xf32> -> vector<8x128xf32>
      %c0_40 = arith.constant 0 : index
      %c0_41 = arith.constant 0 : index
      %59 = vector.load %arg5[%c0_40, %c0_41] : memref<1x128xf32, #tpu.memory_space<vmem>>, vector<1x128xf32>
      %60 = vector.broadcast %59 : vector<1x128xf32> to vector<8x128xf32>
      %61 = arith.addf %58, %60 : vector<8x128xf32>
      %c27_i32 = arith.constant 27 : i32
      %62 = arith.addi %c27_i32, %10 : i32
      %c0_42 = arith.constant 0 : index
      %63 = arith.index_cast %62 : i32 to index
      %c0_43 = arith.constant 0 : index
      %c0_44 = arith.constant 0 : index
      %64 = vector.load %arg1[%c0_42, %63, %c0_43, %c0_44] : memref<1x36x9x4xbf16, #tpu.memory_space<vmem>>, vector<1x1x9x4xbf16>
      %65 = vector.shape_cast %64 : vector<1x1x9x4xbf16> to vector<9x4xbf16>
      %66 = vector.extract_strided_slice %65 {offsets = [0, 0], sizes = [8, 4], strides = [1, 1]} : vector<9x4xbf16> to vector<8x4xbf16>
      %c0_45 = arith.constant 0 : index
      %c0_46 = arith.constant 0 : index
      %67 = vector.load %arg6[%c0_45, %c0_46] : memref<4x128xbf16, #tpu.memory_space<vmem>>, vector<4x128xbf16>
      %cst_47 = arith.constant dense<0.000000e+00> : vector<8x128xf32>
      %68 = tpu.matmul %66, %67, %cst_47 {dimension_numbers = #tpu.dot_dimension_numbers<[1], [0], [0], [1], [0, 0, 1, 1], [], []>} : vector<8x4xbf16>, vector<4x128xbf16>, vector<8x128xf32> -> vector<8x128xf32>
      %c0_48 = arith.constant 0 : index
      %c0_49 = arith.constant 0 : index
      %69 = vector.load %arg7[%c0_48, %c0_49] : memref<1x128xf32, #tpu.memory_space<vmem>>, vector<1x128xf32>
      %70 = vector.broadcast %69 : vector<1x128xf32> to vector<8x128xf32>
      %71 = arith.addf %68, %70 : vector<8x128xf32>
      %72 = arith.addf %61, %71 : vector<8x128xf32>
      %cst_50 = arith.constant 0.000000e+00 : f32
      %73 = vector.broadcast %cst_50 : f32 to vector<8x128xf32>
      %74 = arith.maximumf %72, %73 : vector<8x128xf32>
      %75 = arith.truncf %74 : vector<8x128xf32> to vector<8x128xbf16>
      %c0_51 = arith.constant 0 : index
      %76 = arith.index_cast %10 : i32 to index
      %c0_52 = arith.constant 0 : index
      %c0_53 = arith.constant 0 : index
      %77 = vector.load %arg8[%c0_51, %76, %c0_52, %c0_53] : memref<1x8x8x128xbf16, #tpu.memory_space<vmem>>, vector<1x1x8x128xbf16>
      %78 = vector.shape_cast %77 : vector<1x1x8x128xbf16> to vector<8x128xbf16>
      %79 = vector.shape_cast %75 : vector<8x128xbf16> to vector<1x1x8x128xbf16>
      tpu.vector_store %arg8[%c0_51, %76, %c0_52, %c0_53], %79 {strides = array<i32>} : memref<1x8x8x128xbf16, #tpu.memory_space<vmem>>, vector<1x1x8x128xbf16>,
    }
    %c8_i32_8 = arith.constant 8 : i32
    return
  }
  func.func @transform_0(%arg0: i32) -> (i32, i32, i32, i32) {
    %c0_i32 = arith.constant 0 : i32
    %c0_i32_0 = arith.constant 0 : i32
    %c0_i32_1 = arith.constant 0 : i32
    %c0_i32_2 = arith.constant 0 : i32
    return %arg0, %c0_i32, %c0_i32_0, %c0_i32_1 : i32, i32, i32, i32
  }
  func.func @transform_1(%arg0: i32) -> (i32, i32) {
    %c0_i32 = arith.constant 0 : i32
    %c0_i32_0 = arith.constant 0 : i32
    %c0_i32_1 = arith.constant 0 : i32
    return %c0_i32, %c0_i32_0 : i32, i32
  }
  func.func @transform_2(%arg0: i32) -> (i32, i32) {
    %c0_i32 = arith.constant 0 : i32
    %c0_i32_0 = arith.constant 0 : i32
    %c0_i32_1 = arith.constant 0 : i32
    return %c0_i32, %c0_i32_0 : i32, i32
  }
  func.func @transform_3(%arg0: i32) -> (i32, i32) {
    %c0_i32 = arith.constant 0 : i32
    %c0_i32_0 = arith.constant 0 : i32
    %c0_i32_1 = arith.constant 0 : i32
    return %c0_i32, %c0_i32_0 : i32, i32
  }
  func.func @transform_4(%arg0: i32) -> (i32, i32) {
    %c0_i32 = arith.constant 0 : i32
    %c0_i32_0 = arith.constant 0 : i32
    %c0_i32_1 = arith.constant 0 : i32
    return %c0_i32, %c0_i32_0 : i32, i32
  }
  func.func @transform_5(%arg0: i32) -> (i32, i32) {
    %c0_i32 = arith.constant 0 : i32
    %c0_i32_0 = arith.constant 0 : i32
    %c0_i32_1 = arith.constant 0 : i32
    return %c0_i32, %c0_i32_0 : i32, i32
  }
  func.func @transform_6(%arg0: i32) -> (i32, i32) {
    %c0_i32 = arith.constant 0 : i32
    %c0_i32_0 = arith.constant 0 : i32
    %c0_i32_1 = arith.constant 0 : i32
    return %c0_i32, %c0_i32_0 : i32, i32
  }
  func.func @transform_7(%arg0: i32) -> (i32, i32, i32, i32) {
    %c0_i32 = arith.constant 0 : i32
    %c0_i32_0 = arith.constant 0 : i32
    %c0_i32_1 = arith.constant 0 : i32
    %c0_i32_2 = arith.constant 0 : i32
    return %arg0, %c0_i32, %c0_i32_0, %c0_i32_1 : i32, i32, i32, i32
  }
}

</mosaic_0001>

<bundles_post_ra>
// kernel: residual_block_forward.1
= control target key start
LH: loop header
LB: loop body
LE: loop exit
PB: predicated region body
PF: predicated region fallthrough
CT: control target
= control target key end

     0   :  { %s1140_s24 = smov 0   ;;  %s1256_s0 = inlined_call_operand.vmem [shape: bf16[2,36,9,4], index: 0, kind: input, shape index: {}]   ;;  %s1257_s1 = inlined_call_operand.vmem [shape: bf16[36,128], index: 1, kind: input, shape index: {}]   ;;  %s1258_s2 = inlined_call_operand.vmem [shape: f32[1,128], index: 2, kind: input, shape index: {}]   ;;  %s1259_s3 = inlined_call_operand.vmem [shape: bf16[72,128], index: 3, kind: input, shape index: {}]   ;;  %s1260_s4 = inlined_call_operand.vmem [shape: f32[1,128], index: 4, kind: input, shape index: {}]   ;;  %s1261_s5 = inlined_call_operand.vmem [shape: bf16[4,128], index: 5, kind: input, shape index: {}]   ;;  %s1262_s6 = inlined_call_operand.vmem [shape: f32[1,128], index: 6, kind: input, shape index: {}]   ;;  %s1263_s7 = inlined_call_operand.vmem [shape: bf16[2,8,8,128], index: 7, kind: output, shape index: {}]  }
   0x1 LB: > { %s876_s25 = sadd.s32 4294967295, %s1069_s24   ;;  %p880_p0 = scmp.ge.s32.totalorder %s1069_s24, 1  ;;  %s1069_s24 = sphi %s1140_s24, %s17_s24  }
   0x2   : > { %p237_p1 = scmp.lt.s32.totalorder %s1069_s24, 3 }
   0x4   : > { %p238_p2 = pnand %p880_p0, %p237_p1 }
   0x5   : > { %p269_p3 = scmp.lt.s32.totalorder (!%p238_p2), %s876_s25, 1  ;;  %s1162_s11 = smov (!%p238_p2), 0  }
   0x6   : > { %241 = sbr.rel (%p238_p2) target bundleno = 706 (0x2c2), region = 48 }
   0xb   : > { %vm280_vm0 = vcmask 60416   ;;  %vm282_vm1 = vcmask 57344   ;;  %v1079_v0 = vmov 0   ;;  %s1265_s25 = smov (!%p269_p3, %s876_s25), 1 }
   0xc   : > { %281 = vst.msk [vmem:[#allocation2] sm:$0xf] %vm280_vm0, %v1079_v0  ;;  %285 = vst.msk [vmem:[#allocation2 + $0x48] sm:$0xf] %vm280_vm0, %v1079_v0  ;;  %s988_s26 = smul.u32 288, %s1265_s25  ;;  %s943_s27 = sshll.u32 %s1265_s25, 5 }
   0xd   : > { %283 = vst.msk [vmem:[#allocation2 + $0x4] sm:$0x1] %vm282_vm1, %v1079_v0  ;;  %286 = vst.msk [vmem:[#allocation2 + $0x4c] sm:$0x1] %vm282_vm1, %v1079_v0  ;;  %s1155_s30 = scalar_lea.vmem %s1263_s7, %s943_s27 }
   0xe   : > { %s1160_s10 = scalar_lea.vmem %s1256_s0, %s988_s26 }
   0xf LB: >> { %vm443_vm2 = vcmask 1041408   ;;  %v1080_v1 = vmov 0.0   ;;  %v1042_v2 = vld [vmem:[%s1257_s1 + $0x10] ss:$0 sps:$4 sm:$0x33]   ;;  %s944_s14 = sshll.u32 %s1073_s11, 3  ;;  %s1073_s11 = sphi %s1162_s11, %s292_s11  }
  0x10   : >> { %958 = vmatprep.subr.bf16.mxu0 %v1080_v1  ;;  %s1174_s15 = scalar_lea.vmem %s1160_s10, %s944_s14  ;;  %v445_v3 = vsel %vm443_vm2, %v1042_v2, 0  ;;  %v1043_v4 = vld [vmem:[%s1257_s1 + $0x8] sm:$0xff]   ;;  %s1081_s18 = smov 4   ;;  %v1044_v20 = vld [vmem:[%s1257_s1] sm:$0xff]   ;;  %vm1084_vm3 = vmmov 0   ;;  %vm388_vm4 = vcmask 31744  }
  0x11   : >> { %v1034_v5 = vld [vmem:[%s1174_s15 + $0x48] ss:$0 sps:$4 sm:$0xff]   ;;  %v889_v6 = vld [vmem:[%s1174_s15 + $0x90] sm:$0xf]  ;;  %959 = vmatpush3.bf16.msra.mxu0 %v445_v3  ;;  %v890_v7 = vld [vmem:[%s1174_s15 + $0x94] sm:$0x1]  ;;  %964 = vmatprep.mubr.msk.bf16.mxu0 %vm1084_vm3, %v1080_v1 }
  0x12   : >> { %v900_v8 = vcombine.low %v889_v6, %v889_v6  ;;  %v296_v9 = vld [vmem:[%s1174_s15] sm:$0xf]  ;;  %v297_v10 = vld [vmem:[%s1174_s15 + $0x4] sm:$0x1]  ;;  %960 = vmatprep.subr.bf16.mxu0 %v1080_v1  ;;  %328 = vrot.lane.b32.xlu0 %v1034_v5, %s1081_s18  ;;  %v902_v11 = vcombine.low %v889_v6, %v890_v7  ;;  %v1038_v13 = vld [vmem:[%s1174_s15 + $0xd8] ss:$0 sps:$4 sm:$0xff]  }
  0x13   : >> { %v899_v12 = vcombine.low %v296_v9, %v297_v10  ;;  %s1082_s19 = smov 12   ;;  %v894_v14 = vld [vmem:[%s1174_s15 + $0x8] sm:$0xf]  ;;  %v895_v15 = vld [vmem:[%s1174_s15 + $0xc] sm:$0x1]  ;;  %s1083_s22 = smov 16  }
  0x14   : >> { %347 = vrot.lane.b32.xlu1 %v900_v8, %s1082_s19  ;;  %v360_v16 = vshll.u32 %v902_v11, 16  ;;  %v905_v19 = vcombine.low %v894_v14, %v895_v15  ;;  %v358_v21 = vshrl.u32 %v902_v11, 16  ;;  %v903_v24 = vcombine.low %v894_v14, %v894_v14  ;;  %s1085_s23 = smov 8   ;;  %s1086_s25 = smov 24   ;;  %v1041_v31 = vld [vmem:[%s1174_s15 + $0x50] ss:$0 sps:$4 sm:$0xff]  }
  0x15   : >> { %v336_v17 = vshrl.u32 %v899_v12, 16  ;;  %v338_v18 = vshll.u32 %v899_v12, 16  ;;  %961 = vmatpush3.bf16.msra.mxu0 %v1043_v4  ;;  %s1087_s26 = smov 20   ;;  %s1088_s27 = smov 32   ;;  %vm392_vm5 = vcmask 64512   ;;  %vm395_vm6 = vcmask 97280  }
  0x16   : >> { %962 = vmatprep.subr.bf16.mxu0 %v1080_v1  ;;  %v362_v23 = vrot.slane %v360_v16, 1  ;;  %v380_v25 = vshrl.u32 %v905_v19, 16  ;;  %v382_v26 = vshll.u32 %v905_v19, 16  ;;  %s1089_s28 = smov 28   ;;  %vm398_vm7 = vcmask 130048   ;;  %s827_s9 = scalar_lea.vmem [#allocation2], %s944_s14 }
  0x17   : >> { %v340_v22 = vrot.slane %v338_v18, 1  ;;  %vm401_vm8 = vcmask 162816   ;;  %vm404_vm9 = vcmask 195584   ;;  %vm407_vm10 = vcmask 228352   ;;  %v906_v48 = vld [vmem:[%s1258_s2] ss:$0 sm:$0xff] }
  0x18   : >> { %352 = vrot.lane.b32.xlu1 %v1038_v13, %s1083_s22  ;;  %v384_v28 = vrot.slane %v382_v26, 1  ;;  %v363_v29 = vor.u32 %v362_v23, %v358_v21  ;;  %vm410_vm11 = vcmask 261120   ;;  %vm440_vm12 = vcmask 293888   ;;  %s292_s11 = sadd.s32 1, %s1073_s11  }
  0x19   : >> { %v341_v27 = vor.u32 %v340_v22, %v336_v17  ;;  %963 = vmatpush3.bf16.msra.mxu0 %v1044_v20  ;;  %vm497_vm13 = vcmask 1040384   ;;  %vm498_vm14 = vsmask.f32 256  ;;  %vm501_vm15 = vcmask 1044480   ;;  %p289_p4 = scmp.ge.s32.totalorder %s292_s11, 8  }
  0x1a   : >> { %v385_v30 = vor.u32 %v384_v28, %v380_v25  ;;  %vm502_vm3 = vsmask.f32 4352  ;;  %s1207_s12 = smov (%p289_p4), 0  }
  0x1b   : >> { %342 = vrot.lane.b32.xlu0 %v341_v27, %s1085_s23 }
  0x1c   : >> { %369 = vrot.lane.b32.xlu1 %v903_v24, %s1086_s25 }
  0x1f   : >> { %364 = vrot.lane.b32.xlu0 %v363_v29, %s1087_s26 }
  0x20   : >> { %386 = vrot.lane.b32.xlu1 %v385_v30, %s1088_s27 }
  0x23   : >> { %374 = vrot.lane.b32.xlu0 %v1041_v31, %s1089_s28 }
  0x84   : >> { %v329_v33 = vpop.permute.xlu0 %328 }
  0x85   : >> { %v391_v35 = vsel %vm388_vm4, %v296_v9, %v329_v33 }
  0x86   : >> { %v348_v32 = vpop.permute.xlu1 %347 }
  0x8a   : >> { %v353_v34 = vpop.permute.xlu1 %352 }
  0x8d   : >> { %v343_v36 = vpop.permute.xlu0 %342 }
  0x8e   : >> { %v394_v37 = vsel %vm392_vm5, %v391_v35, %v343_v36  ;;  %v370_v38 = vpop.permute.xlu1 %369 }
  0x8f   : >> { %v397_v39 = vsel %vm395_vm6, %v394_v37, %v348_v32  ;;  %vm499_vm6 = vmand %vm497_vm13, %vm498_vm14 }
  0x90   : >> { %v400_v40 = vsel %vm398_vm7, %v397_v39, %v353_v34 }
  0x91   : >> { %v365_v41 = vpop.permute.xlu0 %364 }
  0x92   : >> { %v403_v42 = vsel %vm401_vm8, %v400_v40, %v365_v41  ;;  %v387_v43 = vpop.permute.xlu1 %386  ;;  %vm503_vm8 = vmand %vm501_vm15, %vm502_vm3 }
  0x93   : >> { %v406_v44 = vsel %vm404_vm9, %v403_v42, %v370_v38 }
  0x95   : >> { %v375_v45 = vpop.permute.xlu0 %374 }
  0x96   : >> { %v409_v46 = vsel %vm407_vm10, %v406_v44, %v375_v45 }
  0x97   : >> { %v412_v47 = vsel %vm410_vm11, %v409_v46, %v387_v43 }
  0x98   : >> { %965 = vmatmul.mubr.msk.bf16.vlgmr.msra.gmra.mxu0 %vm440_vm12, %v412_v47 }
 0x158   : >> { %v481_v49 = vpop.f32.mrf.mxu0 }
 0x159   : >> { %v482_v50 = vadd.f32 %v906_v48, %v481_v49 }
 0x15a   : >> { %v966_v51 = vpop.f32.mrf.mxu0 }
 0x15b   : >> { %v487_v52 = vmax.f32 %v482_v50, 0.0 }
 0x15c   : >> { %v484_v53 = vpop.f32.mrf.mxu0 }
 0x15d   : >> { %v488_v54 = vpack.c.bf16 %v487_v52, %v487_v52 }
 0x15e   : >> { %v967_v55 = vpop.f32.mrf.mxu0 }
 0x15f   : >> { %v490_v56 = vshrl.u32 %v488_v54, 16  ;;  %v493_v58 = vshll.u32 %v488_v54, 16 }
 0x161   : >> { %v492_v57 = vrot.slane %v490_v56, 7 }
 0x163   : >> { %v495_v59 = vor.u32 %v493_v58, %v492_v57 }
 0x165   : >> { %v500_v60 = vsel %vm499_vm6, 0, %v495_v59 }
 0x166   : >> { %v504_v61 = vsel %vm503_vm8, %v500_v60, 0  ;;  %291 = sbr.rel (!%p289_p4) target bundleno = 15 (0xf), region = 105 }
 0x167   : >> { %v911_v62 = vcombine.low %v504_v61, %v504_v61  ;;  %v912_v63 = vcombine.high %v504_v61, %v504_v61 }
 0x169   : >> { %914 = vst.msk [vmem:[%s827_s9 + $0x8] sm:$0xf] %vm280_vm0, %v911_v62 }
 0x16a   : >> { %915 = vst.msk [vmem:[%s827_s9 + $0xc] sm:$0x1] %vm282_vm1, %v912_v63 }
 0x16b LB: >> { %v1050_v0 = vld [vmem:[%s1259_s3 + $0x20] ss:$0 sps:$4 sm:$0xff]   ;;  %v1090_v1 = vmov 0.0   ;;  %vm667_vm10 = vcmask 1043456   ;;  %s945_s14 = sshll.u32 %s1077_s12, 3  ;;  %v1051_v3 = vld [vmem:[%s1259_s3 + $0x18] sm:$0xff]   ;;  %s1077_s12 = sphi %s1207_s12, %s521_s12  }
 0x16c   : >> { %968 = vmatprep.subr.bf16.mxu0 %v1090_v1  ;;  %982 = vmatprep.subr.bf16.mxu1 %v1090_v1  ;;  %v669_v2 = vsel %vm667_vm10, %v1050_v0, 0  ;;  %s524_s17 = scalar_lea.vmem [#allocation2], %s945_s14  ;;  %v716_v14 = vld [vmem:[%s1261_s5] sm:$0x3]  ;;  %s838_s20 = scalar_lea.vmem %s1160_s10, %s945_s14  ;;  %v1052_v18 = vld [vmem:[%s1259_s3 + $0x10] sm:$0xff]   ;;  %vm1093_vm0 = vmmov 0  }
 0x16d   : >> { %969 = vmatpush3.bf16.msra.mxu0 %v669_v2  ;;  %s1091_s21 = smov 24   ;;  %v730_v19 = vsel %vm443_vm2, %v716_v14, 0  ;;  %v937_v24 = vld [vmem:[%s838_s20 + $0xd8] sm:$0xf]  ;;  %s1092_s25 = smov 16   ;;  %984 = vmatprep.mubr.msk.bf16.mxu1 %vm1093_vm0, %v1090_v1  ;;  %v1053_v28 = vld [vmem:[%s1259_s3 + $0x8] sm:$0xff]  }
 0x16e   : >> { %970 = vmatprep.subr.bf16.mxu0 %v1090_v1  ;;  %983 = vmatpush3.bf16.msra.mxu1 %v730_v19  ;;  %s1094_s26 = smov 48   ;;  %s1095_s29 = smov 8   ;;  %v1054_v34 = vld [vmem:[%s1259_s3] sm:$0xff]   ;;  %vm609_vm1 = vcmask 326656   ;;  %vm612_vm12 = vcmask 392192   ;;  %vm615_vm13 = vcmask 457728  }
 0x16f   : >> { %978 = vmatprep.mubr.msk.bf16.mxu0 %vm1093_vm0, %v1090_v1  ;;  %s1096_s8 = smov 32   ;;  %s1097_s15 = smov 40   ;;  %vm618_vm14 = vcmask 523264   ;;  %vm664_vm15 = vcmask 588800   ;;  %v938_v56 = vld [vmem:[%s1262_s6] ss:$0 sm:$0xff] }
 0x170   : >> { %s1098_s14 = smov 64   ;;  %s1099_s11 = smov 56   ;;  %v929_v57 = vld [vmem:[%s1260_s4] ss:$0 sm:$0xff] }
 0x171   : >> { %v919_v4 = vld [vmem:[%s524_s17 + $0x8] sm:$0xf]  ;;  %v920_v5 = vld [vmem:[%s524_s17 + $0xc] sm:$0x1]  ;;  %v1219_v6 = vld [vmem:[%s524_s17] sm:$0xf]  ;;  %971 = vmatpush3.bf16.msra.mxu0 %v1051_v3  ;;  %985 = vmatmul.mubr.msk.bf16.vlgmr.msra.gmra.mxu1 %vm388_vm4, %v937_v24 }
 0x172   : >> { %v925_v7 = vcombine.low %v919_v4, %v919_v4  ;;  %v926_v8 = vcombine.low %v919_v4, %v920_v5  ;;  %v526_v9 = vld [vmem:[%s524_s17 + $0x4] sm:$0x1]  ;;  %v922_v10 = vld [vmem:[%s524_s17 + $0x10] sm:$0xf]  ;;  %v923_v11 = vld [vmem:[%s524_s17 + $0x14] sm:$0x1]  ;;  %972 = vmatprep.subr.bf16.mxu0 %v1090_v1 }
 0x173   : >> { %v924_v12 = vcombine.low %v1219_v6, %v526_v9  ;;  %v928_v13 = vcombine.low %v922_v10, %v923_v11  ;;  %v927_v15 = vcombine.low %v922_v10, %v922_v10  ;;  %s940_s20 = sshll.u32 %s1077_s12, 2  ;;  %s521_s12 = sadd.s32 1, %s1077_s12  }
 0x174   : >> { %559 = vrot.lane.b32.xlu1 %v925_v7, %s1091_s21  ;;  %v565_v16 = vshrl.u32 %v926_v8, 16  ;;  %v567_v17 = vshll.u32 %v926_v8, 16  ;;  %v573_v30 = vrot.slane %v926_v8, 1  ;;  %s776_s21 = scalar_lea.vmem %s1155_s30, %s940_s20  ;;  %p518_p5 = scmp.ge.s32.totalorder %s521_s12, 8  }
 0x175   : >> { %v553_v20 = vrot.slane %v924_v12, 1  ;;  %v545_v21 = vshrl.u32 %v924_v12, 16  ;;  %v547_v22 = vshll.u32 %v924_v12, 16  ;;  %v587_v26 = vshll.u32 %v928_v13, 16  ;;  %973 = vmatpush3.bf16.msra.mxu0 %v1052_v18 }
 0x176   : >> { %v569_v23 = vrot.slane %v567_v17, 1  ;;  %974 = vmatprep.subr.bf16.mxu0 %v1090_v1  ;;  %v585_v31 = vshrl.u32 %v928_v13, 16  ;;  %v593_v33 = vrot.slane %v928_v13, 1 }
 0x177   : >> { %554 = vrot.lane.b32.xlu0 %v553_v20, %s1092_s25  ;;  %v549_v25 = vrot.slane %v547_v22, 1  ;;  %v589_v32 = vrot.slane %v587_v26, 1 }
 0x178   : >> { %579 = vrot.lane.b32.xlu1 %v927_v15, %s1094_s26  ;;  %v570_v27 = vor.u32 %v569_v23, %v565_v16 }
 0x179   : >> { %v550_v29 = vor.u32 %v549_v25, %v545_v21  ;;  %975 = vmatpush3.bf16.msra.mxu0 %v1053_v28  ;;  %v590_v35 = vor.u32 %v589_v32, %v585_v31 }
 0x17a   : >> { %976 = vmatprep.subr.bf16.mxu0 %v1090_v1 }
 0x17b   : >> { %551 = vrot.lane.b32.xlu0 %v550_v29, %s1095_s29 }
 0x17c   : >> { %571 = vrot.lane.b32.xlu1 %v570_v27, %s1096_s8 }
 0x17d   : >> { %977 = vmatpush3.bf16.msra.mxu0 %v1054_v34 }
 0x17f   : >> { %574 = vrot.lane.b32.xlu0 %v573_v30, %s1097_s15 }
 0x180   : >> { %594 = vrot.lane.b32.xlu1 %v593_v33, %s1098_s14 }
 0x183   : >> { %591 = vrot.lane.b32.xlu0 %v590_v35, %s1099_s11 }
 0x1e6   : >> { %v560_v36 = vpop.permute.xlu1 %559 }
 0x1e9   : >> { %v555_v37 = vpop.permute.xlu0 %554 }
 0x1ea   : >> { %v580_v38 = vpop.permute.xlu1 %579 }
 0x1ed   : >> { %v552_v39 = vpop.permute.xlu0 %551 }
 0x1ee   : >> { %v599_v40 = vsel %vm392_vm5, %v1219_v6, %v552_v39  ;;  %v572_v41 = vpop.permute.xlu1 %571 }
 0x1ef   : >> { %v602_v42 = vsel %vm398_vm7, %v599_v40, %v555_v37 }
 0x1f0   : >> { %v605_v43 = vsel %vm404_vm9, %v602_v42, %v560_v36 }
 0x1f1   : >> { %v608_v44 = vsel %vm410_vm11, %v605_v43, %v572_v41  ;;  %v575_v45 = vpop.permute.xlu0 %574 }
 0x1f2   : >> { %v611_v46 = vsel %vm609_vm1, %v608_v44, %v575_v45  ;;  %v595_v47 = vpop.permute.xlu1 %594 }
 0x1f3   : >> { %v614_v48 = vsel %vm612_vm12, %v611_v46, %v580_v38 }
 0x1f5   : >> { %v592_v49 = vpop.permute.xlu0 %591 }
 0x1f6   : >> { %v617_v50 = vsel %vm615_vm13, %v614_v48, %v592_v49 }
 0x1f7   : >> { %v620_v51 = vsel %vm618_vm14, %v617_v50, %v595_v47 }
 0x1f8   : >> { %979 = vmatmul.mubr.msk.bf16.vlgmr.msra.gmra.mxu0 %vm664_vm15, %v620_v51 }
 0x231   : >> { %v766_v52 = vpop.f32.mrf.mxu1 }
 0x232   : >> { %v767_v58 = vadd.f32 %v938_v56, %v766_v52 }
 0x233   : >> { %v986_v53 = vpop.f32.mrf.mxu1 }
 0x235   : >> { %v769_v54 = vpop.f32.mrf.mxu1 }
 0x237   : >> { %v987_v55 = vpop.f32.mrf.mxu1 }
 0x2b8   : >> { %v705_v59 = vpop.f32.mrf.mxu0 }
 0x2b9   : >> { %v706_v60 = vadd.f32 %v929_v57, %v705_v59 }
 0x2ba   : >> { %v980_v61 = vpop.f32.mrf.mxu0 }
 0x2bb   : >> { %v772_v62 = vadd.f32 %v767_v58, %v706_v60 }
 0x2bc   : >> { %v708_v63 = vpop.f32.mrf.mxu0 }
 0x2bd   : >> { %v773_v0 = vmax.f32 %v772_v62, 0.0  ;;  %520 = sbr.rel (!%p518_p5) target bundleno = 363 (0x16b), region = 116 }
 0x2be   : >> { %v981_v1 = vpop.f32.mrf.mxu0 }
 0x2bf   : >> { %v774_v2 = vpack.c.bf16 %v773_v0, %v773_v0 }
 0x2c1   : >> { %777 = vst [vmem:[%s776_s21] sm:$0xf] %v774_v2 }
 0x2c2 PF: > { %s17_s24 = sadd.s32 1, %s1069_s24  }
 0x2c3   : > { %p14_p6 = scmp.ge.s32.totalorder %s17_s24, 4  }
 0x2c5   :  { %16 = sbr.rel (!%p14_p6) target bundleno = 1 (0x1), region = 127 }

</bundles_post_ra>
